<compile_context>
chip_gen: v6e
topology: v6e:2x2x1
jax: 0.10.0
libtpu: 0.0.40
codegen_flags: <defaults>
</compile_context>

<pallas_src>
import functools

import jax
import jax.numpy as jnp
from jax import lax
from jax.experimental import pallas as pl
from jax.experimental.pallas import tpu as pltpu

_LANES = 128


def _round_up(x: int, m: int) -> int:
    return ((x + m - 1) // m) * m


def _pow_gamma(x, gamma):
    """x**gamma specialized for small integer gamma (avoids pow -> exp/log on EUP)."""
    g = float(gamma)
    if g == 2.0:
        return x * x
    if g.is_integer() and 1.0 <= g <= 8.0:
        out = x
        for _ in range(int(g) - 1):
            out = out * x
        return out
    return jnp.power(x, jnp.float32(g))


def _dice_focal_kernel(pred_ref, label_ref, dice_ref, focal_ref,
                       inter_acc, denom_acc, focal_acc, *,
                       epsilon: float, gamma: float, n_voxels: int,
                       categorical: bool, assume_one_hot: bool):
    """Grid = (B, K).  Each step processes a (C, TILE_R, 128) slab of one batch
    element and accumulates per-channel partial sums; the last K step writes the
    per-(batch, channel) dice and focal losses."""
    k = pl.program_id(1)
    kt = pl.num_programs(1)

    @pl.when(k == 0)
    def _init():
        inter_acc[...] = jnp.zeros_like(inter_acc)
        denom_acc[...] = jnp.zeros_like(denom_acc)
        focal_acc[...] = jnp.zeros_like(focal_acc)

    p = pred_ref[0].astype(jnp.float32)                    # (C, TILE_R, 128)

    if categorical:
        lab = label_ref[0]                                 # (TILE_R, 128) int32
        ch = lax.broadcasted_iota(jnp.int32, p.shape, 0)   # channel index per slab
        l = (ch == lab[None, :, :]).astype(jnp.float32)    # one-hot built in-kernel
    else:
        l = label_ref[0].astype(jnp.float32)               # (C, TILE_R, 128)

    prod = p * l                                           # reused by dice + focal
    inter_acc[...] += jnp.sum(prod, axis=1)                # (C, 128)
    denom_acc[...] += jnp.sum(p + l, axis=1)               # (C, 128)

    if assume_one_hot:
        # Exact for one-hot labels: only the true channel contributes, so one
        # log per voxel instead of C.  Padded voxels have l == 0 -> contribute 0.
        p_true = jnp.sum(prod, axis=0)                     # (TILE_R, 128)
        v = _pow_gamma(1.0 - p_true, gamma) * (-jnp.log(jnp.maximum(p_true, 1e-12)))
        focal_elem = l * v[None, :, :]                     # (C, TILE_R, 128)
    else:
        # General (soft / multi-label) per-channel formulation, guarded log.
        focal_elem = l * _pow_gamma(1.0 - p, gamma) * (-jnp.log(jnp.maximum(p, 1e-12)))
    focal_acc[...] += jnp.sum(focal_elem, axis=1)          # (C, 128)

    @pl.when(k == kt - 1)
    def _finalize():
        inter = jnp.sum(inter_acc[...], axis=-1, keepdims=True)   # (C, 1)
        denom = jnp.sum(denom_acc[...], axis=-1, keepdims=True)   # (C, 1)
        fsum = jnp.sum(focal_acc[...], axis=-1, keepdims=True)    # (C, 1)
        dice_ref[...] = (1.0 - 2.0 * inter / (denom + epsilon))[None]
        focal_ref[...] = (fsum * (1.0 / float(n_voxels)))[None]


def _per_channel_losses(pred, label, *, categorical: bool, epsilon: float,
                        gamma: float, assume_one_hot: bool):
    """Returns per-(batch, channel) dice and focal losses, each shape (B, C) f32."""
    B, C = int(pred.shape[0]), int(pred.shape[1])
    S = 1
    for d in pred.shape[2:]:
        S *= int(d)

    # Keep bf16 pred in HBM if given (upcast in-kernel); otherwise f32.
    p_dtype = jnp.bfloat16 if pred.dtype == jnp.bfloat16 else jnp.float32
    pred = pred.astype(p_dtype).reshape(B, C, S)
    p_isize = jnp.dtype(p_dtype).itemsize
    p_per_row = _LANES * C * p_isize

    if categorical:
        label = label.astype(jnp.int32).reshape(B, S)
        l_per_row = _LANES * 4
    else:
        label = label.astype(p_dtype).reshape(B, C, S)
        l_per_row = _LANES * C * jnp.dtype(p_dtype).itemsize

    # Spatial tiling: rows of 128 lanes; TILE_R rows per grid step.
    r_min = (S + _LANES - 1) // _LANES
    budget = 12 * 1024 * 1024                       # double-buffered input pipeline
    tile_r = budget // (2 * (p_per_row + l_per_row))
    tile_r = max(8, min(2048, (tile_r // 8) * 8))
    tile_r = min(tile_r, _round_up(r_min, 8))
    R = _round_up(r_min, tile_r)
    kt = R // tile_r
    s_pad = R * _LANES

    if s_pad != S:
        pred = jnp.pad(pred, ((0, 0), (0, 0), (0, s_pad - S)))
        if categorical:
            # -1 matches no channel -> padded voxels contribute nothing.
            label = jnp.pad(label, ((0, 0), (0, s_pad - S)), constant_values=-1)
        else:
            label = jnp.pad(label, ((0, 0), (0, 0), (0, s_pad - S)))

    pred = pred.reshape(B, C, R, _LANES)
    if categorical:
        label = label.reshape(B, R, _LANES)
        label_spec = pl.BlockSpec((1, tile_r, _LANES), lambda b, k: (b, k, 0))
    else:
        label = label.reshape(B, C, R, _LANES)
        label_spec = pl.BlockSpec((1, C, tile_r, _LANES), lambda b, k: (b, 0, k, 0))

    pipeline_bytes = 2 * tile_r * (p_per_row + l_per_row)
    vmem_limit = int(min(64 << 20, max(24 << 20, 3 * pipeline_bytes)))

    kernel = functools.partial(
        _dice_focal_kernel, epsilon=float(epsilon), gamma=float(gamma),
        n_voxels=S, categorical=categorical, assume_one_hot=assume_one_hot)

    dice_pc, focal_pc = pl.pallas_call(
        kernel,
        out_shape=(jax.ShapeDtypeStruct((B, C, 1), jnp.float32),
                   jax.ShapeDtypeStruct((B, C, 1), jnp.float32)),
        grid=(B, kt),
        in_specs=[
            pl.BlockSpec((1, C, tile_r, _LANES), lambda b, k: (b, 0, k, 0)),
            label_spec,
        ],
        out_specs=(
            pl.BlockSpec((1, C, 1), lambda b, k: (b, 0, 0)),
            pl.BlockSpec((1, C, 1), lambda b, k: (b, 0, 0)),
        ),
        scratch_shapes=[
            pltpu.VMEM((C, _LANES), jnp.float32),   # intersection partials
            pltpu.VMEM((C, _LANES), jnp.float32),   # denominator partials
            pltpu.VMEM((C, _LANES), jnp.float32),   # focal partials
        ],
        compiler_params=pltpu.CompilerParams(
            dimension_semantics=("parallel", "arbitrary"),
            vmem_limit_bytes=vmem_limit),
    )(pred, label)

    return dice_pc[..., 0], focal_pc[..., 0]


def dice_with_focal_loss(pred, label, *,
                         include_background: bool = True,
                         mask=None, weights=None,
                         reduce_channels: bool = True,
                         reduction: str = "mean",
                         epsilon: float = 1e-6,
                         lam: float = 0.5,
                         gamma: float = 2.0,
                         assume_one_hot: bool = True):
    """JAX/Pallas equivalent of DiceWithFocalLoss.forward.

    pred:  (B, C, X, Y, Z) probabilities (f32 or bf16).
    label: one-hot (B, C, X, Y, Z) or categorical (B, X, Y, Z).
    assume_one_hot: set False if labels may be soft / multi-label (keeps the
                    exact per-channel focal formulation).
    """
    pred = jnp.asarray(pred)
    label = jnp.asarray(label)

    if label.shape == pred.shape:
        categorical = False
    elif label.shape == (pred.shape[0],) + tuple(pred.shape[2:]):
        categorical = True
        assume_one_hot = True   # categorical labels are one-hot by construction
    else:
        raise ValueError(
            "DiceWithFocalLoss expects label to be one-hot-encoded and match "
            "prediction shape, or categorical and match on all dims except channels.")

    dice_pc, focal_pc = _per_channel_losses(
        pred, label, categorical=categorical, epsilon=epsilon, gamma=gamma,
        assume_one_hot=assume_one_hot)

    def _reduce(loss_pc):
        if not include_background:
            loss_pc = loss_pc[:, 1:]
        # TODO(synk): exact mymi mask/weights semantics unavailable; basic handling.
        if mask is not None:
            m = jnp.asarray(mask, jnp.float32)
            if not include_background:
                m = m[:, 1:]
            loss_pc_m = loss_pc * m
            if weights is not None:
                w = jnp.asarray(weights, jnp.float32)
                if not include_background:
                    w = w[:, 1:]
                loss_b = jnp.sum(loss_pc_m * w, axis=1)
            elif reduce_channels:
                loss_b = jnp.sum(loss_pc_m, axis=1) / jnp.maximum(jnp.sum(m, axis=1), 1.0)
            else:
                loss_b = loss_pc_m
        elif weights is not None:
            w = jnp.asarray(weights, jnp.float32)
            if not include_background:
                w = w[:, 1:]
            loss_b = jnp.sum(loss_pc * w, axis=1)
        elif reduce_channels:
            loss_b = jnp.mean(loss_pc, axis=1)
        else:
            loss_b = loss_pc
        if reduction == "mean":
            return jnp.mean(loss_b)
        elif reduction == "sum":
            return jnp.sum(loss_b)
        else:
            raise ValueError(f"Unknown reduction '{reduction}'.")

    return _reduce(dice_pc) + lam * _reduce(focal_pc)


def _reference_loss(pred, label, epsilon=1e-6, lam=0.5, gamma=2.0):
    """Pure-JAX reference for correctness checking."""
    B, C = pred.shape[:2]
    p = pred.reshape(B, C, -1).astype(jnp.float32)
    l = label.reshape(B, C, -1).astype(jnp.float32)
    inter = jnp.sum(p * l, axis=-1)
    denom = jnp.sum(p + l, axis=-1)
    dice_loss = 1.0 - 2.0 * inter / (denom + epsilon)
    focal = -l * (1.0 - p) ** gamma * jnp.log(jnp.maximum(p, 1e-12))
    focal_loss = jnp.mean(focal, axis=-1)
    return jnp.mean(jnp.mean(dice_loss, axis=1)) + lam * jnp.mean(jnp.mean(focal_loss, axis=1))


if __name__ == "__main__":
    key = jax.random.PRNGKey(0)
    B, C, X, Y, Z = 2, 4, 8, 8, 8

    k_logits, k_label = jax.random.split(key)
    logits = jax.random.normal(k_logits, (B, C, X, Y, Z), dtype=jnp.float32)
    pred = jax.nn.softmax(logits, axis=1)                              # probabilities
    label_cat = jax.random.randint(k_label, (B, X, Y, Z), 0, C)        # categorical
    label = jax.nn.one_hot(label_cat, C, axis=1, dtype=jnp.float32)    # one-hot

    loss_onehot = jax.block_until_ready(dice_with_focal_loss(pred, label))
    loss_cat = jax.block_until_ready(dice_with_focal_loss(pred, label_cat))

    ref = jax.block_until_ready(_reference_loss(pred, label))
    assert jnp.allclose(loss_onehot, ref, rtol=1e-5, atol=1e-5), (loss_onehot, ref)
    assert jnp.allclose(loss_cat, ref, rtol=1e-5, atol=1e-5), (loss_cat, ref)

    print("KERNEL_OK")
</pallas_src>

<mosaic_0001>
module attributes {stable_mosaic.version = 11 : i64} {
  func.func @_dice_focal_kernel(%arg0: i32, %arg1: i32, %arg2: memref<1x4x8x128xf32, #tpu.memory_space<vmem>>, %arg3: memref<1x4x8x128xf32, #tpu.memory_space<vmem>>, %arg4: memref<1x4x1xf32, #tpu.memory_space<vmem>>, %arg5: memref<1x4x1xf32, #tpu.memory_space<vmem>>, %arg6: memref<4x128xf32, #tpu.memory_space<vmem>>, %arg7: memref<4x128xf32, #tpu.memory_space<vmem>>, %arg8: memref<4x128xf32, #tpu.memory_space<vmem>>) attributes {dimension_semantics = [#tpu.dimension_semantics<parallel>, #tpu.dimension_semantics<arbitrary>], iteration_bounds = array<i64: 2, 1>, scalar_prefetch = 0 : i64, scratch_operands = 3 : i64, tpu.core_type = #tpu.core_type<tc>, window_params = [{transform_indices = @transform_0, window_bounds = array<i64: 1, 4, 8, 128>}, {transform_indices = @transform_1, window_bounds = array<i64: 1, 4, 8, 128>}, {transform_indices = @transform_2, window_bounds = array<i64: 1, 4, 1>}, {transform_indices = @transform_3, window_bounds = array<i64: 1, 4, 1>}]} {
    %c0_i32 = arith.constant 0 : i32
    %0 = arith.cmpi eq, %arg1, %c0_i32 : i32
    %1 = arith.extui %0 : i1 to i32
    %c0_i32_0 = arith.constant 0 : i32
    %2 = arith.cmpi ne, %1, %c0_i32_0 : i32
    scf.if %2 {
      %cst_28 = arith.constant 0.000000e+00 : f32
      %37 = vector.broadcast %cst_28 : f32 to vector<4x128xf32>
      %c0_29 = arith.constant 0 : index
      %c0_30 = arith.constant 0 : index
      %38 = vector.load %arg6[%c0_29, %c0_30] : memref<4x128xf32, #tpu.memory_space<vmem>>, vector<4x128xf32>
      tpu.vector_store %arg6[%c0_29, %c0_30], %37 {strides = array<i32>} : memref<4x128xf32, #tpu.memory_space<vmem>>, vector<4x128xf32>,
      %cst_31 = arith.constant 0.000000e+00 : f32
      %39 = vector.broadcast %cst_31 : f32 to vector<4x128xf32>
      %c0_32 = arith.constant 0 : index
      %c0_33 = arith.constant 0 : index
      %40 = vector.load %arg7[%c0_32, %c0_33] : memref<4x128xf32, #tpu.memory_space<vmem>>, vector<4x128xf32>
      tpu.vector_store %arg7[%c0_32, %c0_33], %39 {strides = array<i32>} : memref<4x128xf32, #tpu.memory_space<vmem>>, vector<4x128xf32>,
      %cst_34 = arith.constant 0.000000e+00 : f32
      %41 = vector.broadcast %cst_34 : f32 to vector<4x128xf32>
      %c0_35 = arith.constant 0 : index
      %c0_36 = arith.constant 0 : index
      %42 = vector.load %arg8[%c0_35, %c0_36] : memref<4x128xf32, #tpu.memory_space<vmem>>, vector<4x128xf32>
      tpu.vector_store %arg8[%c0_35, %c0_36], %41 {strides = array<i32>} : memref<4x128xf32, #tpu.memory_space<vmem>>, vector<4x128xf32>,
    } else {
    }
    %c0 = arith.constant 0 : index
    %c0_1 = arith.constant 0 : index
    %c0_2 = arith.constant 0 : index
    %c0_3 = arith.constant 0 : index
    %3 = vector.load %arg2[%c0, %c0_1, %c0_2, %c0_3] : memref<1x4x8x128xf32, #tpu.memory_space<vmem>>, vector<1x4x8x128xf32>
    %4 = vector.shape_cast %3 : vector<1x4x8x128xf32> to vector<4x8x128xf32>
    %c0_4 = arith.constant 0 : index
    %c0_5 = arith.constant 0 : index
    %c0_6 = arith.constant 0 : index
    %c0_7 = arith.constant 0 : index
    %5 = vector.load %arg3[%c0_4, %c0_5, %c0_6, %c0_7] : memref<1x4x8x128xf32, #tpu.memory_space<vmem>>, vector<1x4x8x128xf32>
    %6 = vector.shape_cast %5 : vector<1x4x8x128xf32> to vector<4x8x128xf32>
    %7 = arith.mulf %4, %6 : vector<4x8x128xf32>
    %c0_8 = arith.constant 0 : index
    %c0_9 = arith.constant 0 : index
    %8 = vector.load %arg6[%c0_8, %c0_9] : memref<4x128xf32, #tpu.memory_space<vmem>>, vector<4x128xf32>
    %cst = arith.constant dense<0.000000e+00> : vector<4x128xf32>
    %9 = vector.multi_reduction <add>, %7, %cst [1] : vector<4x8x128xf32> to vector<4x128xf32>
    %10 = arith.addf %8, %9 : vector<4x128xf32>
    %c0_10 = arith.constant 0 : index
    %c0_11 = arith.constant 0 : index
    %11 = vector.load %arg6[%c0_10, %c0_11] : memref<4x128xf32, #tpu.memory_space<vmem>>, vector<4x128xf32>
    tpu.vector_store %arg6[%c0_10, %c0_11], %10 {strides = array<i32>} : memref<4x128xf32, #tpu.memory_space<vmem>>, vector<4x128xf32>,
    %c0_12 = arith.constant 0 : index
    %c0_13 = arith.constant 0 : index
    %12 = vector.load %arg7[%c0_12, %c0_13] : memref<4x128xf32, #tpu.memory_space<vmem>>, vector<4x128xf32>
    %13 = arith.addf %4, %6 : vector<4x8x128xf32>
    %cst_14 = arith.constant dense<0.000000e+00> : vector<4x128xf32>
    %14 = vector.multi_reduction <add>, %13, %cst_14 [1] : vector<4x8x128xf32> to vector<4x128xf32>
    %15 = arith.addf %12, %14 : vector<4x128xf32>
    %c0_15 = arith.constant 0 : index
    %c0_16 = arith.constant 0 : index
    %16 = vector.load %arg7[%c0_15, %c0_16] : memref<4x128xf32, #tpu.memory_space<vmem>>, vector<4x128xf32>
    tpu.vector_store %arg7[%c0_15, %c0_16], %15 {strides = array<i32>} : memref<4x128xf32, #tpu.memory_space<vmem>>, vector<4x128xf32>,
    %cst_17 = arith.constant dense<0.000000e+00> : vector<8x128xf32>
    %17 = vector.multi_reduction <add>, %7, %cst_17 [0] : vector<4x8x128xf32> to vector<8x128xf32>
    %cst_18 = arith.constant 1.000000e+00 : f32
    %18 = vector.broadcast %cst_18 : f32 to vector<8x128xf32>
    %19 = arith.subf %18, %17 : vector<8x128xf32>
    %20 = arith.mulf %19, %19 : vector<8x128xf32>
    %cst_19 = arith.constant 9.99999996E-13 : f32
    %21 = vector.broadcast %cst_19 : f32 to vector<8x128xf32>
    %22 = arith.maximumf %17, %21 : vector<8x128xf32>
    %23 = math.log %22 : vector<8x128xf32>
    %cst_20 = arith.constant 0.000000e+00 : f32
    %24 = vector.broadcast %cst_20 : f32 to vector<8x128xf32>
    %25 = arith.subf %24, %23 : vector<8x128xf32>
    %26 = arith.mulf %20, %25 : vector<8x128xf32>
    %27 = vector.shape_cast %26 : vector<8x128xf32> to vector<1x8x128xf32>
    %28 = vector.broadcast %27 : vector<1x8x128xf32> to vector<4x8x128xf32>
    %29 = arith.mulf %6, %28 : vector<4x8x128xf32>
    %c0_21 = arith.constant 0 : index
    %c0_22 = arith.constant 0 : index
    %30 = vector.load %arg8[%c0_21, %c0_22] : memref<4x128xf32, #tpu.memory_space<vmem>>, vector<4x128xf32>
    %cst_23 = arith.constant dense<0.000000e+00> : vector<4x128xf32>
    %31 = vector.multi_reduction <add>, %29, %cst_23 [1] : vector<4x8x128xf32> to vector<4x128xf32>
    %32 = arith.addf %30, %31 : vector<4x128xf32>
    %c0_24 = arith.constant 0 : index
    %c0_25 = arith.constant 0 : index
    %33 = vector.load %arg8[%c0_24, %c0_25] : memref<4x128xf32, #tpu.memory_space<vmem>>, vector<4x128xf32>
    tpu.vector_store %arg8[%c0_24, %c0_25], %32 {strides = array<i32>} : memref<4x128xf32, #tpu.memory_space<vmem>>, vector<4x128xf32>,
    %c0_i32_26 = arith.constant 0 : i32
    %34 = arith.cmpi eq, %arg1, %c0_i32_26 : i32
    %35 = arith.extui %34 : i1 to i32
    %c0_i32_27 = arith.constant 0 : i32
    %36 = arith.cmpi ne, %35, %c0_i32_27 : i32
    scf.if %36 {
      %c0_28 = arith.constant 0 : index
      %c0_29 = arith.constant 0 : index
      %37 = vector.load %arg6[%c0_28, %c0_29] : memref<4x128xf32, #tpu.memory_space<vmem>>, vector<4x128xf32>
      %cst_30 = arith.constant dense<0.000000e+00> : vector<4xf32>
      %38 = vector.multi_reduction <add>, %37, %cst_30 [1] : vector<4x128xf32> to vector<4xf32>
      %39 = vector.shape_cast %38 : vector<4xf32> to vector<4x1xf32>
      %c0_31 = arith.constant 0 : index
      %c0_32 = arith.constant 0 : index
      %40 = vector.load %arg7[%c0_31, %c0_32] : memref<4x128xf32, #tpu.memory_space<vmem>>, vector<4x128xf32>
      %cst_33 = arith.constant dense<0.000000e+00> : vector<4xf32>
      %41 = vector.multi_reduction <add>, %40, %cst_33 [1] : vector<4x128xf32> to vector<4xf32>
      %42 = vector.shape_cast %41 : vector<4xf32> to vector<4x1xf32>
      %c0_34 = arith.constant 0 : index
      %c0_35 = arith.constant 0 : index
      %43 = vector.load %arg8[%c0_34, %c0_35] : memref<4x128xf32, #tpu.memory_space<vmem>>, vector<4x128xf32>
      %cst_36 = arith.constant dense<0.000000e+00> : vector<4xf32>
      %44 = vector.multi_reduction <add>, %43, %cst_36 [1] : vector<4x128xf32> to vector<4xf32>
      %45 = vector.shape_cast %44 : vector<4xf32> to vector<4x1xf32>
      %cst_37 = arith.constant 2.000000e+00 : f32
      %46 = vector.broadcast %cst_37 : f32 to vector<4x1xf32>
      %47 = arith.mulf %46, %39 : vector<4x1xf32>
      %cst_38 = arith.constant 9.99999997E-7 : f32
      %48 = vector.broadcast %cst_38 : f32 to vector<4x1xf32>
      %49 = arith.addf %42, %48 : vector<4x1xf32>
      %50 = arith.divf %47, %49 : vector<4x1xf32>
      %cst_39 = arith.constant 1.000000e+00 : f32
      %51 = vector.broadcast %cst_39 : f32 to vector<4x1xf32>
      %52 = arith.subf %51, %50 : vector<4x1xf32>
      %53 = vector.shape_cast %52 : vector<4x1xf32> to vector<1x4x1xf32>
      %c0_40 = arith.constant 0 : index
      %c0_41 = arith.constant 0 : index
      %c0_42 = arith.constant 0 : index
      %54 = vector.load %arg4[%c0_40, %c0_41, %c0_42] : memref<1x4x1xf32, #tpu.memory_space<vmem>>, vector<1x4x1xf32>
      tpu.vector_store %arg4[%c0_40, %c0_41, %c0_42], %53 {strides = array<i32>} : memref<1x4x1xf32, #tpu.memory_space<vmem>>, vector<1x4x1xf32>,
      %cst_43 = arith.constant 0.001953125 : f32
      %55 = vector.broadcast %cst_43 : f32 to vector<4x1xf32>
      %56 = arith.mulf %45, %55 : vector<4x1xf32>
      %57 = vector.shape_cast %56 : vector<4x1xf32> to vector<1x4x1xf32>
      %c0_44 = arith.constant 0 : index
      %c0_45 = arith.constant 0 : index
      %c0_46 = arith.constant 0 : index
      %58 = vector.load %arg5[%c0_44, %c0_45, %c0_46] : memref<1x4x1xf32, #tpu.memory_space<vmem>>, vector<1x4x1xf32>
      tpu.vector_store %arg5[%c0_44, %c0_45, %c0_46], %57 {strides = array<i32>} : memref<1x4x1xf32, #tpu.memory_space<vmem>>, vector<1x4x1xf32>,
    } else {
    }
    return
  }
  func.func @transform_0(%arg0: i32, %arg1: i32) -> (i32, i32, i32, i32) {
    %c0_i32 = arith.constant 0 : i32
    %c0_i32_0 = arith.constant 0 : i32
    %c0_i32_1 = arith.constant 0 : i32
    return %arg0, %c0_i32, %arg1, %c0_i32_0 : i32, i32, i32, i32
  }
  func.func @transform_1(%arg0: i32, %arg1: i32) -> (i32, i32, i32, i32) {
    %c0_i32 = arith.constant 0 : i32
    %c0_i32_0 = arith.constant 0 : i32
    %c0_i32_1 = arith.constant 0 : i32
    return %arg0, %c0_i32, %arg1, %c0_i32_0 : i32, i32, i32, i32
  }
  func.func @transform_2(%arg0: i32, %arg1: i32) -> (i32, i32, i32) {
    %c0_i32 = arith.constant 0 : i32
    %c0_i32_0 = arith.constant 0 : i32
    %c0_i32_1 = arith.constant 0 : i32
    return %arg0, %c0_i32, %c0_i32_0 : i32, i32, i32
  }
  func.func @transform_3(%arg0: i32, %arg1: i32) -> (i32, i32, i32) {
    %c0_i32 = arith.constant 0 : i32
    %c0_i32_0 = arith.constant 0 : i32
    %c0_i32_1 = arith.constant 0 : i32
    return %arg0, %c0_i32, %c0_i32_0 : i32, i32, i32
  }
}

</mosaic_0001>

<bundles_post_ra>
// kernel: tpu_custom_call.1
= control target key start
LH: loop header
LB: loop body
LE: loop exit
PB: predicated region body
PF: predicated region fallthrough
CT: control target
= control target key end

     0   :  { %9 = vsyncpa [#allocation6], 0  ;;  %s943_s0 = inlined_call_operand.hbm [shape: f32[2,4,8,128], index: 0, kind: input, shape index: {}]   ;;  %s944_s1 = inlined_call_operand.hbm [shape: f32[2,4,8,128], index: 1, kind: input, shape index: {}]   ;;  %s945_s2 = inlined_call_operand.vmem [shape: f32[2,4,1], index: 2, kind: output, shape index: {0}]   ;;  %s946_s3 = inlined_call_operand.vmem [shape: f32[2,4,1], index: 3, kind: output, shape index: {1}]  }
   0x1   :  { %11 = vsyncpa [#allocation6 + $0x1], 0 }
   0x2   :  { %12 = vsyncpa [#allocation8], 0 }
   0x3   :  { %14 = vsyncpa [#allocation8 + $0x1], 0  ;;  %s782_s12 = smov 0   ;;  %s784_s13 = smov 0  }
   0x4   :  { %s786_s14 = smov 0   ;;  %s788_s15 = smov 0  }
   0x5   :  { %s790_s16 = smov 0   ;;  %s792_s17 = smov 0  }
   0x6 LB: > { %s559_s18 = sadd.s32 4294967295, %s755_s17   ;;  %s32_s19 = sadd.s32 1, %s751_s16  ;;  %s755_s17 = sphi %s792_s17, %s20_s17   ;;  %s751_s16 = sphi %s790_s16, %s955_s16   ;;  %s747_s15 = sphi %s788_s15, %s954_s15   ;;  %s743_s14 = sphi %s786_s14, %s953_s14   ;;  %s739_s13 = sphi %s784_s13, %s952_s13   ;;  %s735_s12 = sphi %s782_s12, %s951_s12  }
   0x7   : > { %p34_p0 = scmp.ge.s32.totalorder %s32_s19, 2  ;;  %s41_s20 = sadd.s32 1, %s743_s14 }
   0x8   : > { %p48_p1 = scmp.ne.s32.totalorder %s743_s14, %s739_s13  ;;  %p49_p2 = scmp.eq.s32.totalorder %s755_s17, 0 }
   0x9   : > { %s957_s19 = smov (%p34_p0, %s32_s19), 0  ;;  %p54_p4 = scmp.ne.s32.totalorder %s739_s13, %s735_s12 }
   0xa   : > { %p818_p3 = por %p49_p2, %p48_p1  ;;  %s36_s22 = ssub.s32 %s751_s16, %s957_s19 }
   0xb   : > { %p55_p5 = scmp.eq.s32.totalorder %s559_s18, 0  ;;  %p39_p6 = scmp.eq.s32.totalorder %s36_s22, 0 }
   0xc   : > { %p589_p8 = scmp.lt.s32.totalorder %s755_s17, 2  ;;  %s834_s25 = sand.u32 1, %s743_s14  }
   0xd   : > { %p825_p7 = por %p55_p5, %p54_p4  ;;  %s576_s26 = sshll.u32 %s751_s16, 9 }
   0xe   : > { %s831_s24 = scalar_select %p39_p6, %s743_s14, %s41_s20  }
   0xf   : > { %s563_s27 = sshll.u32 %s834_s25, 5  ;;  %s169_s30 = scalar_lea.hbm %s943_s0, %s576_s26 }
  0x10   : > { %s162_s4 = scalar_lea.vmem [#allocation5], %s563_s27  ;;  %p845_p9 = pnand %p589_p8, %p818_p3 }
  0x11   : > { %s170_s5 = sshll.u32 %s162_s4, 4  ;;  %s159_s7 = scalar_lea.sflag [#allocation6], %s834_s25  ;;  %s171_s5 = int_to_ptr.vmem [resolvable:$true] %s170_s5 }
  0x12   : > { %p647_p10 = pneg %p845_p9  ;;  %s658_s8 = scalar_lea.vmem %s171_s5, 512 }
  0x13   : > { %p659_p11 = scmp.ne.s32.totalorder %s171_s5, %s658_s8  ;;  %s757_s9 = smov [#allocation5]  }
  0x14   : > { %s663_s10 = sshll.u32 %s757_s9, 4  ;;  %s664_s10 = int_to_ptr.vmem [resolvable:$false] %s663_s10 }
  0x15   : > { %p661_p12 = pnand %p659_p11, %p647_p10  ;;  %s665_s11 = scalar_lea.vmem %s664_s10, 1024 }
  0x16   : > { %p666_p0 = scmp.lt.s32.totalorder %s171_s5, %s664_s10  ;;  %p667_p1 = scmp.lt.s32.totalorder %s665_s11, %s658_s8 }
  0x17   : > { %p662_p13 = pneg %p661_p12 }
  0x18   : > { %p668_p2 = por %p667_p1, %p666_p0 }
  0x1a   : > { %p669_p3 = pnand %p668_p2, %p662_p13 }
  0x1c   : > { %672 = shalt.err (!%p669_p3)
}
  0x1d   : > { %s758_s12 = smov 128   ;;  %s759_s18 = smov 8  }
  0x1e   : > { %585 = dma.hbm_to_vmem [thread:$0]  (!%p845_p9), %s169_s30, 512, %s171_s5, %s159_s7, %s758_s12, %s758_s12, %s759_s18  }
  0x1f   : > { %p569_p4 = scmp.ge.s32.totalorder %s755_s17, 1  ;;  %p200_p5 = scmp.lt.s32.totalorder %s755_s17, 3 }
  0x20   : > { %s191_s28 = scalar_lea.hbm %s944_s1, %s576_s26  ;;  %s184_s29 = scalar_lea.vmem [#allocation7], %s563_s27 }
  0x21   : > { %p859_p6 = pnand %p569_p4, %p200_p5  ;;  %s192_s4 = sshll.u32 %s184_s29, 4  ;;  %s193_s4 = int_to_ptr.vmem [resolvable:$true] %s192_s4 }
  0x22   : > { %s181_s8 = scalar_lea.sflag [#allocation8], %s834_s25  ;;  %s686_s9 = scalar_lea.vmem %s193_s4, 512 }
  0x23   : > { %p687_p8 = scmp.ne.s32.totalorder %s193_s4, %s686_s9  ;;  %s760_s30 = smov [#allocation7]  }
  0x24   : > { %s691_s5 = sshll.u32 %s760_s30, 4  ;;  %s692_s5 = int_to_ptr.vmem [resolvable:$false] %s691_s5 }
  0x25   : > { %p689_p11 = pnand %p687_p8, %p647_p10  ;;  %s693_s7 = scalar_lea.vmem %s692_s5, 1024 }
  0x26   : > { %p694_p13 = scmp.lt.s32.totalorder %s193_s4, %s692_s5  ;;  %p695_p0 = scmp.lt.s32.totalorder %s693_s7, %s686_s9 }
  0x27   : > { %p690_p12 = pneg %p689_p11 }
  0x28   : > { %p696_p1 = por %p695_p0, %p694_p13 }
  0x2a   : > { %p697_p2 = pnand %p696_p1, %p690_p12 }
  0x2c   : > { %700 = shalt.err (!%p697_p2)
}
  0x2d   : > { %588 = dma.hbm_to_vmem [thread:$0]  (!%p845_p9), %s191_s28, 512, %s193_s4, %s181_s8, %s758_s12, %s758_s12, %s759_s18  }
  0x2e   : > { %204 = sbr.rel (%p859_p6) target bundleno = 256 (0x100), region = 28  ;;  %s206_s25 = sand.u32 (!%p859_p6), 1, %s739_s13  }
  0x2f   : > { %s570_s26 = sshll.u32 (!%p859_p6), %s206_s25, 5  ;;  %s207_s27 = scalar_lea.sflag (!%p859_p6), [#allocation6], %s206_s25 }
  0x30   : > { %s210_s10 = scalar_lea.vmem (!%p859_p6), [#allocation5], %s570_s26 }
  0x33   : > { %726 = dma.done.wait (%p825_p7), %s207_s27, 512  }
  0x34   : > { %728 = vsyncadd (%p825_p7), %s207_s27, 4294966784  ;;  %s216_s11 = scalar_lea.sflag [#allocation8], %s206_s25  ;;  %s219_s21 = scalar_lea.vmem [#allocation7], %s570_s26 }
  0x35   : > { %730 = dma.done.wait (%p825_p7), %s216_s11, 512  }
  0x36   : > { %732 = vsyncadd (%p825_p7), %s216_s11, 4294966784  ;;  %v761_v0 = vmov 0.0   ;;  %v265_v1 = vld [vmem:[%s210_s10] sm:$0xff]  ;;  %v266_v2 = vld [vmem:[%s210_s10 + $0x8] sm:$0xff]  ;;  %vm306_vm0 = vcmask 1041409   ;;  %vm308_vm1 = vcmask 1042434  }
  0x37   : > { %263 = vst [vmem:[#allocation3] sm:$0xf] %v761_v0  ;;  %262 = vst [vmem:[#allocation2] sm:$0xf] %v761_v0  ;;  %v267_v3 = vld [vmem:[%s210_s10 + $0x10] sm:$0xff]  ;;  %v268_v4 = vld [vmem:[%s210_s10 + $0x18] sm:$0xff] }
  0x38   : > { %264 = vst [vmem:[#allocation4] sm:$0xf] %v761_v0  ;;  %v885_v5 = vld [vmem:[%s219_s21] sm:$0xff]  ;;  %v887_v6 = vld [vmem:[%s219_s21 + $0x8] sm:$0xff]  ;;  %v889_v7 = vld [vmem:[%s219_s21 + $0x10] sm:$0xff]  ;;  %vm310_vm2 = vcmask 1043459  }
  0x39   : > { %v891_v8 = vld [vmem:[%s219_s21 + $0x18] sm:$0xff]  ;;  %v273_v9 = vmul.f32 %v885_v5, %v265_v1  ;;  %v274_v10 = vmul.f32 %v887_v6, %v266_v2  ;;  %v316_v11 = vadd.f32 %v885_v5, %v265_v1  ;;  %v317_v12 = vadd.f32 %v887_v6, %v266_v2  ;;  %p250_p7 = scmp.lt.s32.totalorder %s747_s15, 1 }
  0x3a   : > { %v275_v13 = vmul.f32 %v889_v7, %v267_v3  ;;  %v276_v14 = vmul.f32 %v891_v8, %v268_v4  ;;  %v318_v15 = vadd.f32 %v889_v7, %v267_v3  ;;  %v319_v16 = vadd.f32 %v891_v8, %v268_v4 }
  0x3b   : > { %v320_v17 = vrot.slane %v316_v11, 4  ;;  %v326_v18 = vrot.slane %v317_v12, 4  ;;  %v354_v19 = vadd.f32 %v274_v10, %v273_v9  ;;  %v278_v20 = vrot.slane %v273_v9, 4  ;;  %s959_s15 = smov (!%p250_p7, %s747_s15), 1 }
  0x3c   : > { %v332_v21 = vrot.slane %v318_v15, 4  ;;  %v338_v22 = vrot.slane %v319_v16, 4  ;;  %v284_v23 = vrot.slane %v274_v10, 4  ;;  %v290_v24 = vrot.slane %v275_v13, 4  ;;  %s572_s23 = sshll.u32 %s959_s15, 2 }
  0x3d   : > { %v321_v25 = vadd.f32 %v320_v17, %v316_v11  ;;  %v327_v26 = vadd.f32 %v326_v18, %v317_v12  ;;  %v355_v27 = vadd.f32 %v354_v19, %v275_v13  ;;  %v279_v28 = vadd.f32 %v278_v20, %v273_v9  ;;  %s253_s18 = scalar_lea.vmem %s945_s2, %s572_s23  ;;  %s257_s28 = scalar_lea.vmem %s946_s3, %s572_s23 }
  0x3e   : > { %v333_v29 = vadd.f32 %v332_v21, %v318_v15  ;;  %v339_v30 = vadd.f32 %v338_v22, %v319_v16  ;;  %v285_v31 = vadd.f32 %v284_v23, %v274_v10  ;;  %v291_v32 = vadd.f32 %v290_v24, %v275_v13  ;;  %v315_v61 = vld [vmem:[#allocation3] sm:$0xf]  ;;  %v277_v17 = vld [vmem:[#allocation2] sm:$0xf] }
  0x3f   : > { %v322_v33 = vrot.slane %v321_v25, 2  ;;  %v328_v34 = vrot.slane %v327_v26, 2  ;;  %v356_v35 = vadd.f32 %v355_v27, %v276_v14  ;;  %v280_v36 = vrot.slane %v279_v28, 2 }
  0x40   : > { %v334_v37 = vrot.slane %v333_v29, 2  ;;  %v340_v38 = vrot.slane %v339_v30, 2  ;;  %v286_v39 = vrot.slane %v285_v31, 2  ;;  %v292_v43 = vrot.slane %v291_v32, 2 }
  0x41   : > { %v323_v40 = vadd.f32 %v322_v33, %v321_v25  ;;  %v329_v41 = vadd.f32 %v328_v34, %v327_v26  ;;  %v359_v42 = vmax.f32 %v356_v35, 1e-12  ;;  %v281_v46 = vadd.f32 %v280_v36, %v279_v28 }
  0x42   : > { %v335_v44 = vadd.f32 %v334_v37, %v333_v29  ;;  %v341_v45 = vadd.f32 %v340_v38, %v339_v30  ;;  %v287_v47 = vadd.f32 %v286_v39, %v285_v31  ;;  %v293_v56 = vadd.f32 %v292_v43, %v291_v32 }
  0x43   : > { %v324_v48 = vrot.slane %v323_v40, 1  ;;  %v330_v49 = vrot.slane %v329_v41, 1  ;;  %641 = vlog2.f32 %v359_v42  ;;  %v282_v52 = vrot.slane %v281_v46, 1 }
  0x44   : > { %v336_v50 = vrot.slane %v335_v44, 1  ;;  %v342_v51 = vrot.slane %v341_v45, 1  ;;  %v288_v53 = vrot.slane %v287_v47, 1  ;;  %v296_v57 = vrot.slane %v276_v14, 4 }
  0x45   : > { %v325_v54 = vadd.f32 %v324_v48, %v323_v40  ;;  %v331_v55 = vadd.f32 %v330_v49, %v329_v41  ;;  %v283_v60 = vadd.f32 %v282_v52, %v281_v46  ;;  %v294_v0 = vrot.slane %v293_v56, 1 }
  0x46   : > { %v337_v58 = vadd.f32 %v336_v50, %v335_v44  ;;  %v343_v59 = vadd.f32 %v342_v51, %v341_v45  ;;  %v289_v63 = vadd.f32 %v288_v53, %v287_v47  ;;  %v297_v1 = vadd.f32 %v296_v57, %v276_v14  ;;  %v368_v53 = vld [vmem:[#allocation4] sm:$0xf] }
  0x47   : > { %v348_v62 = vsel %vm306_vm0, %v331_v55, %v325_v54  ;;  %v295_v10 = vadd.f32 %v294_v0, %v293_v56  ;;  %v357_v13 = vsub.f32 1.0, %v356_v35  ;;  %vm407_vm3 = vcmask 1043456  }
  0x48   : > { %v349_v2 = vsel %vm308_vm1, %v337_v58, %v348_v62  ;;  %v298_v4 = vrot.slane %v297_v1, 2  ;;  %v307_v12 = vsel %vm306_vm0, %v289_v63, %v283_v60  ;;  %vm424_vm4 = vcmask 3072  }
  0x49   : > { %v350_v3 = vsel %vm310_vm2, %v343_v59, %v349_v2  ;;  %v309_v16 = vsel %vm308_vm1, %v295_v10, %v307_v12  ;;  %v358_v20 = vmul.f32 %v357_v13, %v357_v13 }
  0x4a   : > { %v352_v9 = vadd.f32 %v350_v3, %v315_v61  ;;  %v299_v11 = vadd.f32 %v298_v4, %v297_v1 }
  0x4c   : > { %353 = vst [vmem:[#allocation3] sm:$0xf] %v352_v9  ;;  %v300_v15 = vrot.slane %v299_v11, 1 }
  0x4e   : > { %v301_v18 = vadd.f32 %v300_v15, %v299_v11 }
  0x50   : > { %v642_v19 = vpop.eup %641  ;;  %v311_v14 = vsel %vm310_vm2, %v301_v18, %v309_v16 }
  0x51   : > { %v361_v21 = vmul.f32 0.6931472, %v642_v19  ;;  %v313_v22 = vadd.f32 %v311_v14, %v277_v17 }
  0x53   : > { %v411_v23 = vld [vmem:[#allocation3] sm:$0xf]  ;;  %v362_v24 = vsub.f32 0.0, %v361_v21  ;;  %314 = vst [vmem:[#allocation2] sm:$0xf] %v313_v22 }
  0x54   : > { %v412_v25 = vsel %vm407_vm3, %v411_v23, 0.0 }
  0x55   : > { %413 = vadd.xlane.f32.xlu0 %v412_v25  ;;  %v363_v26 = vmul.f32 %v362_v24, %v358_v20 }
  0x57   : > { %v364_v27 = vmul.f32 %v363_v26, %v885_v5  ;;  %v365_v28 = vmul.f32 %v363_v26, %v887_v6  ;;  %v366_v29 = vmul.f32 %v363_v26, %v889_v7  ;;  %v367_v30 = vmul.f32 %v363_v26, %v891_v8 }
  0x59   : > { %v369_v31 = vrot.slane %v364_v27, 4  ;;  %v375_v32 = vrot.slane %v365_v28, 4  ;;  %v381_v33 = vrot.slane %v366_v29, 4  ;;  %v387_v34 = vrot.slane %v367_v30, 4 }
  0x5a   : > { %v406_v35 = vld [vmem:[#allocation2] sm:$0xf] }
  0x5b   : > { %v370_v36 = vadd.f32 %v369_v31, %v364_v27  ;;  %v376_v37 = vadd.f32 %v375_v32, %v365_v28  ;;  %v382_v38 = vadd.f32 %v381_v33, %v366_v29  ;;  %v388_v39 = vadd.f32 %v387_v34, %v367_v30 }
  0x5c   : > { %v408_v40 = vsel %vm407_vm3, %v406_v35, 0.0 }
  0x5d   : > { %409 = vadd.xlane.f32.xlu0 %v408_v40  ;;  %v371_v41 = vrot.slane %v370_v36, 2  ;;  %v377_v5 = vrot.slane %v376_v37, 2  ;;  %v383_v42 = vrot.slane %v382_v38, 2  ;;  %v389_v6 = vrot.slane %v388_v39, 2 }
  0x5f   : > { %v372_v43 = vadd.f32 %v371_v41, %v370_v36  ;;  %v378_v7 = vadd.f32 %v377_v5, %v376_v37  ;;  %v384_v44 = vadd.f32 %v383_v42, %v382_v38  ;;  %v390_v8 = vadd.f32 %v389_v6, %v388_v39 }
  0x61   : > { %v373_v45 = vrot.slane %v372_v43, 1  ;;  %v379_v46 = vrot.slane %v378_v7, 1  ;;  %v385_v47 = vrot.slane %v384_v44, 1  ;;  %v391_v48 = vrot.slane %v390_v8, 1 }
  0x63   : > { %v374_v49 = vadd.f32 %v373_v45, %v372_v43  ;;  %v380_v50 = vadd.f32 %v379_v46, %v378_v7  ;;  %v386_v51 = vadd.f32 %v385_v47, %v384_v44  ;;  %v392_v52 = vadd.f32 %v391_v48, %v390_v8 }
  0x65   : > { %v397_v54 = vsel %vm306_vm0, %v380_v50, %v374_v49 }
  0x66   : > { %v398_v55 = vsel %vm308_vm1, %v386_v51, %v397_v54 }
  0x67   : > { %v399_v56 = vsel %vm310_vm2, %v392_v52, %v398_v55 }
  0x68   : > { %v401_v57 = vadd.f32 %v399_v56, %v368_v53 }
  0x6a   : > { %402 = vst [vmem:[#allocation4] sm:$0xf] %v401_v57 }
  0x71   : > { %v415_v58 = vld [vmem:[#allocation4] sm:$0xf] }
  0x72   : > { %v416_v59 = vsel %vm407_vm3, %v415_v58, 0.0 }
  0x73   : > { %417 = vadd.xlane.f32.xlu1 %v416_v59 }
  0xde   : > { %v414_v60 = vpop.xlane.xlu0 %413 }
  0xdf   : > { %v420_v61 = vadd.f32 1e-06, %v414_v60 }
  0xe1   : > { %643 = vrcp.f32 %v420_v61 }
  0xe6   : > { %v410_v62 = vpop.xlane.xlu0 %409 }
  0xe7   : > { %v419_v63 = vmul.f32 2.0, %v410_v62 }
  0xee   : > { %v644_v0 = vpop.eup %643 }
  0xef   : > { %v422_v1 = vmul.f32 %v644_v0, %v419_v63 }
  0xf1   : > { %v423_v2 = vsub.f32 1.0, %v422_v1 }
  0xf3   : > { %425 = vst.msk [vmem:[%s253_s18] sm:$0xf] %vm424_vm4, %v423_v2 }
  0xfc   : > { %v418_v3 = vpop.xlane.xlu1 %417 }
  0xfd   : > { %v426_v4 = vmul.f32 0.001953125, %v418_v3 }
  0xff   : > { %427 = vst.msk [vmem:[%s257_s28] sm:$0xf] %vm424_vm4, %v426_v4 }
 0x100 PF: > { %s20_s17 = sadd.s32 1, %s755_s17   ;;  %s951_s12 = smov %s739_s13 }
 0x101   : > { %p17_p9 = scmp.ge.s32.totalorder %s20_s17, 4   ;;  %s952_s13 = smov %s743_s14 }
 0x102   : > { %s953_s14 = smov %s831_s24  ;;  %s954_s15 = smov %s751_s16 }
 0x103   : > { %s955_s16 = smov %s957_s19  ;;  %19 = sbr.rel (!%p17_p9) target bundleno = 6 (0x6), region = 101 }
 0x108   :  { %461 = vsyncpa [#allocation6], 1 }
 0x109   :  { %463 = vsyncpa [#allocation6 + $0x1], 1 }
 0x10a   :  { %464 = vsyncpa [#allocation8], 1 }
 0x10b   :  { %466 = vsyncpa [#allocation8 + $0x1], 1 }

</bundles_post_ra>
